<compile_context>
chip_gen: v7x
topology: tpu7x:2x2x1
jax: 0.10.0
libtpu: 0.0.40
codegen_flags: <defaults>
</compile_context>

<pallas_src>
import functools

import jax
import jax.numpy as jnp
from jax import lax
from jax.experimental import pallas as pl
from jax.experimental.pallas import tpu as pltpu

MAX_LEN = 128       # max_len   (lane dimension; multiple of 128)
NB_KEY_CHAN = 16    # nb_key_chan
NB_V_CHAN = 8       # nb_v_chan
QUERY_WIDTH = 8     # query_width (k of top-k)
DELTA = 1e-3        # delta


def _dnd_kernel(key_ref, mem_ref, packed_ref, *, nb_v, k, delta):
    """key (C,1); mem (C+L, L) = [keys^T ; values lane-padded] -> packed (1, L).

    packed lanes:  [0 .. V-1]        out
                   [V .. V+K-1]      weights
                   [V+K .. V+2K-1]   int32 inds bitcast to f32
    """
    C = key_ref.shape[0]
    L = packed_ref.shape[1]
    V, K = nb_v, k

    # --- inverse-distance kernel: (C, L) -> (1, L), channel reduce on the MXU ---
    keys_t = mem_ref[0:C, :]                               # (C, L)
    diff = keys_t - key_ref[...]                           # (C, L) - (C, 1)
    ones_c = jnp.ones((1, C), jnp.float32)
    d2 = jnp.dot(ones_c, diff * diff,
                 preferred_element_type=jnp.float32)       # (1, L) >= 0
    lookup = 1.0 / (d2 + delta)                            # (1, L), strictly > 0
    inv_total = 1.0 / jnp.sum(lookup)                      # scalar; epilogue only

    lane = lax.broadcasted_iota(jnp.int32, (1, L), 1)      # (1, L)

    # --- iterative top-K, fully unrolled, all state in registers ---
    lw = lookup                                            # working copy (1, L)
    w_row = jnp.zeros((1, L), jnp.float32)                 # unnormalized top values
    i_row = jnp.zeros((1, L), jnp.int32)                   # selected indices
    for i in range(K):                                     # K=8: trace-time unroll
        m = jnp.max(lw, axis=1, keepdims=True)             # (1,1)  <-- serial chain
        sel = lw >= m                                      # (1,L) mask (ties removed together)
        lw = jnp.where(sel, 0.0, lw)                       # next max depends only on this
        # argmax (min index within mask) is off the critical chain: only fills i_row
        idx = jnp.min(jnp.where(sel, lane, L), axis=1, keepdims=True)   # (1,1)
        w_row = jnp.where(lane == V + i, m, w_row)
        i_row = jnp.where(lane == V + K + i, idx, i_row)

    # --- weighted sum of selected value rows, emitted directly as packed lanes ---
    wsel = lookup - lw                                     # selected lanes keep lookup, rest 0
    vals_pad = mem_ref[C:C + L, :]                         # (L, L): values in lanes 0..V-1, 0 beyond
    out_row = jnp.dot(wsel, vals_pad,
                      preferred_element_type=jnp.float32)  # (1, L): out in lanes 0..V-1
    fp = (out_row + w_row) * inv_total                     # normalize out and weights together
    packed_ref[...] = jnp.where(lane < V + K, fp,
                                pltpu.bitcast(i_row, jnp.float32))


def pack_dnd_memory(keys, values):
    """One-time (module init / after append) packing of the persistent DND memory.

    keys: (L, C), values: (L, V)  ->  (C + L, L) f32 buffer:
      rows 0..C-1 : keys^T
      rows C..C+L-1 : values in lanes 0..V-1, zero elsewhere (dense DMA, MXU-ready)
    """
    L, C = keys.shape
    Lv, V = values.shape
    assert Lv == L and L % 128 == 0 and V <= L
    mem = jnp.zeros((C + L, L), jnp.float32)
    mem = mem.at[:C, :].set(keys.T.astype(jnp.float32))
    mem = mem.at[C:, :V].set(values.astype(jnp.float32))
    return mem


@functools.partial(jax.jit, static_argnames=("nb_v_chan", "query_width"))
def pruning_dnd_forward(key, mem, *, nb_v_chan=NB_V_CHAN, query_width=QUERY_WIDTH):
    """key: (C,), mem: packed (C + L, L) persistent buffer
    -> (out (1, V), inds (K,) int32, weights (K,))"""
    C = key.shape[0]
    rows, L = mem.shape
    V, K = nb_v_chan, query_width
    assert rows == C + L and V + 2 * K <= L and L % 128 == 0

    kernel = functools.partial(_dnd_kernel, nb_v=V, k=K, delta=DELTA)
    packed = pl.pallas_call(
        kernel,
        out_shape=jax.ShapeDtypeStruct((1, L), jnp.float32),
        in_specs=[pl.BlockSpec(memory_space=pltpu.MemorySpace.VMEM),
                  pl.BlockSpec(memory_space=pltpu.MemorySpace.VMEM)],
        out_specs=pl.BlockSpec(memory_space=pltpu.MemorySpace.VMEM),
    )(key.reshape(C, 1).astype(jnp.float32), mem)

    out = packed[:, :V]                                    # (1, V)
    weights = packed[0, V:V + K]                           # (K,)
    inds = jax.lax.bitcast_convert_type(packed[0, V + K:V + 2 * K], jnp.int32)
    return out, inds, weights                              # inds int32 (torch gives int64)


if __name__ == "__main__":
    k0, k1, k2 = jax.random.split(jax.random.PRNGKey(0), 3)
    # __init__: keys = rand(max_len, nb_key_chan); values = zeros(max_len, nb_v_chan)
    # (values initialized randomly here so the weighted sum is non-trivial)
    keys = jax.random.uniform(k0, (MAX_LEN, NB_KEY_CHAN), dtype=jnp.float32)
    values = jax.random.normal(k1, (MAX_LEN, NB_V_CHAN), dtype=jnp.float32)
    key = jax.random.uniform(k2, (NB_KEY_CHAN,), dtype=jnp.float32)

    # Persistent DND memory is packed once at "module init"; no per-call reshuffling.
    mem = pack_dnd_memory(keys, values)

    out, inds, weights = jax.block_until_ready(pruning_dnd_forward(key, mem))

    # pure-JAX reference (mirrors the PyTorch forward)
    lookup = 1.0 / (jnp.sum((key[None, :] - keys) ** 2, axis=1) + DELTA)
    top_vals, top_inds = jax.lax.top_k(lookup, QUERY_WIDTH)
    w_ref = top_vals / jnp.sum(lookup)
    out_ref = jnp.sum(values[top_inds] * w_ref[:, None], axis=0, keepdims=True)

    assert out.shape == (1, NB_V_CHAN)
    assert inds.shape == (QUERY_WIDTH,) and weights.shape == (QUERY_WIDTH,)
    assert jnp.array_equal(inds, top_inds.astype(jnp.int32)), (inds, top_inds)
    assert jnp.allclose(weights, w_ref, rtol=1e-5, atol=1e-6), (weights, w_ref)
    assert jnp.allclose(out, out_ref, rtol=1e-5, atol=1e-5), (out, out_ref)

    print("KERNEL_OK")
</pallas_src>

<mosaic_0001>
module attributes {stable_mosaic.version = 11 : i64} {
  func.func @_dnd_kernel(%arg0: memref<16x1xf32, #tpu.memory_space<vmem>>, %arg1: memref<144x128xf32, #tpu.memory_space<vmem>>, %arg2: memref<1x128xf32, #tpu.memory_space<vmem>>) attributes {dimension_semantics = [], scalar_prefetch = 0 : i64, scratch_operands = 0 : i64, tpu.core_type = #tpu.core_type<tc>} {
    %c0 = arith.constant 0 : index
    %c0_0 = arith.constant 0 : index
    %0 = vector.load %arg1[%c0, %c0_0] : memref<144x128xf32, #tpu.memory_space<vmem>>, vector<16x128xf32>
    %c0_1 = arith.constant 0 : index
    %c0_2 = arith.constant 0 : index
    %1 = vector.load %arg0[%c0_1, %c0_2] : memref<16x1xf32, #tpu.memory_space<vmem>>, vector<16x1xf32>
    %2 = vector.broadcast %1 : vector<16x1xf32> to vector<16x128xf32>
    %3 = arith.subf %0, %2 : vector<16x128xf32>
    %cst = arith.constant 1.000000e+00 : f32
    %4 = vector.broadcast %cst : f32 to vector<1x16xf32>
    %5 = arith.mulf %3, %3 : vector<16x128xf32>
    %cst_3 = arith.constant dense<0.000000e+00> : vector<1x128xf32>
    %6 = tpu.matmul %4, %5, %cst_3 {dimension_numbers = #tpu.dot_dimension_numbers<[1], [0], [0], [1], [0, 0, 1, 1], [], []>} : vector<1x16xf32>, vector<16x128xf32>, vector<1x128xf32> -> vector<1x128xf32>
    %cst_4 = arith.constant 1.000000e-03 : f32
    %7 = vector.broadcast %cst_4 : f32 to vector<1x128xf32>
    %8 = arith.addf %6, %7 : vector<1x128xf32>
    %cst_5 = arith.constant 1.000000e+00 : f32
    %9 = vector.broadcast %cst_5 : f32 to vector<1x128xf32>
    %10 = arith.divf %9, %8 : vector<1x128xf32>
    %11 = vector.shape_cast %10 : vector<1x128xf32> to vector<1x1x128xf32>
    %cst_6 = arith.constant dense<0.000000e+00> : vector<1xf32>
    %12 = vector.multi_reduction <add>, %11, %cst_6 [1, 2] : vector<1x1x128xf32> to vector<1xf32>
    %13 = vector.shape_cast %12 : vector<1xf32> to vector<1x1x1xf32>
    %14 = vector.extract %13[0, 0, 0] : f32 from vector<1x1x1xf32>
    %cst_7 = arith.constant 1.000000e+00 : f32
    %15 = arith.divf %cst_7, %14 : f32
    %16 = tpu.iota {dimensions = array<i32: 1>} : vector<1x128xi32>
    %cst_8 = arith.constant 0.000000e+00 : f32
    %17 = vector.broadcast %cst_8 : f32 to vector<1x128xf32>
    %c0_i32 = arith.constant 0 : i32
    %18 = vector.broadcast %c0_i32 : i32 to vector<1x128xi32>
    %cst_9 = arith.constant dense<0xFF800000> : vector<1xf32>
    %19 = vector.multi_reduction <maximumf>, %10, %cst_9 [1] : vector<1x128xf32> to vector<1xf32>
    %20 = vector.shape_cast %19 : vector<1xf32> to vector<1x1xf32>
    %21 = vector.broadcast %20 : vector<1x1xf32> to vector<1x128xf32>
    %22 = arith.cmpf oge, %10, %21 : vector<1x128xf32>
    %cst_10 = arith.constant 0.000000e+00 : f32
    %23 = vector.broadcast %cst_10 : f32 to vector<1x128xf32>
    %24 = arith.select %22, %23, %10 : vector<1x128xi1>, vector<1x128xf32>
    %c128_i32 = arith.constant 128 : i32
    %25 = vector.broadcast %c128_i32 : i32 to vector<1x128xi32>
    %26 = arith.select %22, %16, %25 : vector<1x128xi1>, vector<1x128xi32>
    %cst_11 = arith.constant dense<2147483647> : vector<1xi32>
    %27 = vector.multi_reduction <minsi>, %26, %cst_11 [1] : vector<1x128xi32> to vector<1xi32>
    %28 = vector.shape_cast %27 : vector<1xi32> to vector<1x1xi32>
    %c8_i32 = arith.constant 8 : i32
    %29 = vector.broadcast %c8_i32 : i32 to vector<1x128xi32>
    %30 = arith.cmpi eq, %16, %29 : vector<1x128xi32>
    %31 = vector.shape_cast %20 : vector<1x1xf32> to vector<1x1xf32>
    %32 = vector.broadcast %31 : vector<1x1xf32> to vector<1x128xf32>
    %33 = arith.select %30, %32, %17 : vector<1x128xi1>, vector<1x128xf32>
    %c16_i32 = arith.constant 16 : i32
    %34 = vector.broadcast %c16_i32 : i32 to vector<1x128xi32>
    %35 = arith.cmpi eq, %16, %34 : vector<1x128xi32>
    %36 = vector.shape_cast %28 : vector<1x1xi32> to vector<1x1xi32>
    %37 = vector.broadcast %36 : vector<1x1xi32> to vector<1x128xi32>
    %38 = arith.select %35, %37, %18 : vector<1x128xi1>, vector<1x128xi32>
    %cst_12 = arith.constant dense<0xFF800000> : vector<1xf32>
    %39 = vector.multi_reduction <maximumf>, %24, %cst_12 [1] : vector<1x128xf32> to vector<1xf32>
    %40 = vector.shape_cast %39 : vector<1xf32> to vector<1x1xf32>
    %41 = vector.broadcast %40 : vector<1x1xf32> to vector<1x128xf32>
    %42 = arith.cmpf oge, %24, %41 : vector<1x128xf32>
    %cst_13 = arith.constant 0.000000e+00 : f32
    %43 = vector.broadcast %cst_13 : f32 to vector<1x128xf32>
    %44 = arith.select %42, %43, %24 : vector<1x128xi1>, vector<1x128xf32>
    %c128_i32_14 = arith.constant 128 : i32
    %45 = vector.broadcast %c128_i32_14 : i32 to vector<1x128xi32>
    %46 = arith.select %42, %16, %45 : vector<1x128xi1>, vector<1x128xi32>
    %cst_15 = arith.constant dense<2147483647> : vector<1xi32>
    %47 = vector.multi_reduction <minsi>, %46, %cst_15 [1] : vector<1x128xi32> to vector<1xi32>
    %48 = vector.shape_cast %47 : vector<1xi32> to vector<1x1xi32>
    %c9_i32 = arith.constant 9 : i32
    %49 = vector.broadcast %c9_i32 : i32 to vector<1x128xi32>
    %50 = arith.cmpi eq, %16, %49 : vector<1x128xi32>
    %51 = vector.shape_cast %40 : vector<1x1xf32> to vector<1x1xf32>
    %52 = vector.broadcast %51 : vector<1x1xf32> to vector<1x128xf32>
    %53 = arith.select %50, %52, %33 : vector<1x128xi1>, vector<1x128xf32>
    %c17_i32 = arith.constant 17 : i32
    %54 = vector.broadcast %c17_i32 : i32 to vector<1x128xi32>
    %55 = arith.cmpi eq, %16, %54 : vector<1x128xi32>
    %56 = vector.shape_cast %48 : vector<1x1xi32> to vector<1x1xi32>
    %57 = vector.broadcast %56 : vector<1x1xi32> to vector<1x128xi32>
    %58 = arith.select %55, %57, %38 : vector<1x128xi1>, vector<1x128xi32>
    %cst_16 = arith.constant dense<0xFF800000> : vector<1xf32>
    %59 = vector.multi_reduction <maximumf>, %44, %cst_16 [1] : vector<1x128xf32> to vector<1xf32>
    %60 = vector.shape_cast %59 : vector<1xf32> to vector<1x1xf32>
    %61 = vector.broadcast %60 : vector<1x1xf32> to vector<1x128xf32>
    %62 = arith.cmpf oge, %44, %61 : vector<1x128xf32>
    %cst_17 = arith.constant 0.000000e+00 : f32
    %63 = vector.broadcast %cst_17 : f32 to vector<1x128xf32>
    %64 = arith.select %62, %63, %44 : vector<1x128xi1>, vector<1x128xf32>
    %c128_i32_18 = arith.constant 128 : i32
    %65 = vector.broadcast %c128_i32_18 : i32 to vector<1x128xi32>
    %66 = arith.select %62, %16, %65 : vector<1x128xi1>, vector<1x128xi32>
    %cst_19 = arith.constant dense<2147483647> : vector<1xi32>
    %67 = vector.multi_reduction <minsi>, %66, %cst_19 [1] : vector<1x128xi32> to vector<1xi32>
    %68 = vector.shape_cast %67 : vector<1xi32> to vector<1x1xi32>
    %c10_i32 = arith.constant 10 : i32
    %69 = vector.broadcast %c10_i32 : i32 to vector<1x128xi32>
    %70 = arith.cmpi eq, %16, %69 : vector<1x128xi32>
    %71 = vector.shape_cast %60 : vector<1x1xf32> to vector<1x1xf32>
    %72 = vector.broadcast %71 : vector<1x1xf32> to vector<1x128xf32>
    %73 = arith.select %70, %72, %53 : vector<1x128xi1>, vector<1x128xf32>
    %c18_i32 = arith.constant 18 : i32
    %74 = vector.broadcast %c18_i32 : i32 to vector<1x128xi32>
    %75 = arith.cmpi eq, %16, %74 : vector<1x128xi32>
    %76 = vector.shape_cast %68 : vector<1x1xi32> to vector<1x1xi32>
    %77 = vector.broadcast %76 : vector<1x1xi32> to vector<1x128xi32>
    %78 = arith.select %75, %77, %58 : vector<1x128xi1>, vector<1x128xi32>
    %cst_20 = arith.constant dense<0xFF800000> : vector<1xf32>
    %79 = vector.multi_reduction <maximumf>, %64, %cst_20 [1] : vector<1x128xf32> to vector<1xf32>
    %80 = vector.shape_cast %79 : vector<1xf32> to vector<1x1xf32>
    %81 = vector.broadcast %80 : vector<1x1xf32> to vector<1x128xf32>
    %82 = arith.cmpf oge, %64, %81 : vector<1x128xf32>
    %cst_21 = arith.constant 0.000000e+00 : f32
    %83 = vector.broadcast %cst_21 : f32 to vector<1x128xf32>
    %84 = arith.select %82, %83, %64 : vector<1x128xi1>, vector<1x128xf32>
    %c128_i32_22 = arith.constant 128 : i32
    %85 = vector.broadcast %c128_i32_22 : i32 to vector<1x128xi32>
    %86 = arith.select %82, %16, %85 : vector<1x128xi1>, vector<1x128xi32>
    %cst_23 = arith.constant dense<2147483647> : vector<1xi32>
    %87 = vector.multi_reduction <minsi>, %86, %cst_23 [1] : vector<1x128xi32> to vector<1xi32>
    %88 = vector.shape_cast %87 : vector<1xi32> to vector<1x1xi32>
    %c11_i32 = arith.constant 11 : i32
    %89 = vector.broadcast %c11_i32 : i32 to vector<1x128xi32>
    %90 = arith.cmpi eq, %16, %89 : vector<1x128xi32>
    %91 = vector.shape_cast %80 : vector<1x1xf32> to vector<1x1xf32>
    %92 = vector.broadcast %91 : vector<1x1xf32> to vector<1x128xf32>
    %93 = arith.select %90, %92, %73 : vector<1x128xi1>, vector<1x128xf32>
    %c19_i32 = arith.constant 19 : i32
    %94 = vector.broadcast %c19_i32 : i32 to vector<1x128xi32>
    %95 = arith.cmpi eq, %16, %94 : vector<1x128xi32>
    %96 = vector.shape_cast %88 : vector<1x1xi32> to vector<1x1xi32>
    %97 = vector.broadcast %96 : vector<1x1xi32> to vector<1x128xi32>
    %98 = arith.select %95, %97, %78 : vector<1x128xi1>, vector<1x128xi32>
    %cst_24 = arith.constant dense<0xFF800000> : vector<1xf32>
    %99 = vector.multi_reduction <maximumf>, %84, %cst_24 [1] : vector<1x128xf32> to vector<1xf32>
    %100 = vector.shape_cast %99 : vector<1xf32> to vector<1x1xf32>
    %101 = vector.broadcast %100 : vector<1x1xf32> to vector<1x128xf32>
    %102 = arith.cmpf oge, %84, %101 : vector<1x128xf32>
    %cst_25 = arith.constant 0.000000e+00 : f32
    %103 = vector.broadcast %cst_25 : f32 to vector<1x128xf32>
    %104 = arith.select %102, %103, %84 : vector<1x128xi1>, vector<1x128xf32>
    %c128_i32_26 = arith.constant 128 : i32
    %105 = vector.broadcast %c128_i32_26 : i32 to vector<1x128xi32>
    %106 = arith.select %102, %16, %105 : vector<1x128xi1>, vector<1x128xi32>
    %cst_27 = arith.constant dense<2147483647> : vector<1xi32>
    %107 = vector.multi_reduction <minsi>, %106, %cst_27 [1] : vector<1x128xi32> to vector<1xi32>
    %108 = vector.shape_cast %107 : vector<1xi32> to vector<1x1xi32>
    %c12_i32 = arith.constant 12 : i32
    %109 = vector.broadcast %c12_i32 : i32 to vector<1x128xi32>
    %110 = arith.cmpi eq, %16, %109 : vector<1x128xi32>
    %111 = vector.shape_cast %100 : vector<1x1xf32> to vector<1x1xf32>
    %112 = vector.broadcast %111 : vector<1x1xf32> to vector<1x128xf32>
    %113 = arith.select %110, %112, %93 : vector<1x128xi1>, vector<1x128xf32>
    %c20_i32 = arith.constant 20 : i32
    %114 = vector.broadcast %c20_i32 : i32 to vector<1x128xi32>
    %115 = arith.cmpi eq, %16, %114 : vector<1x128xi32>
    %116 = vector.shape_cast %108 : vector<1x1xi32> to vector<1x1xi32>
    %117 = vector.broadcast %116 : vector<1x1xi32> to vector<1x128xi32>
    %118 = arith.select %115, %117, %98 : vector<1x128xi1>, vector<1x128xi32>
    %cst_28 = arith.constant dense<0xFF800000> : vector<1xf32>
    %119 = vector.multi_reduction <maximumf>, %104, %cst_28 [1] : vector<1x128xf32> to vector<1xf32>
    %120 = vector.shape_cast %119 : vector<1xf32> to vector<1x1xf32>
    %121 = vector.broadcast %120 : vector<1x1xf32> to vector<1x128xf32>
    %122 = arith.cmpf oge, %104, %121 : vector<1x128xf32>
    %cst_29 = arith.constant 0.000000e+00 : f32
    %123 = vector.broadcast %cst_29 : f32 to vector<1x128xf32>
    %124 = arith.select %122, %123, %104 : vector<1x128xi1>, vector<1x128xf32>
    %c128_i32_30 = arith.constant 128 : i32
    %125 = vector.broadcast %c128_i32_30 : i32 to vector<1x128xi32>
    %126 = arith.select %122, %16, %125 : vector<1x128xi1>, vector<1x128xi32>
    %cst_31 = arith.constant dense<2147483647> : vector<1xi32>
    %127 = vector.multi_reduction <minsi>, %126, %cst_31 [1] : vector<1x128xi32> to vector<1xi32>
    %128 = vector.shape_cast %127 : vector<1xi32> to vector<1x1xi32>
    %c13_i32 = arith.constant 13 : i32
    %129 = vector.broadcast %c13_i32 : i32 to vector<1x128xi32>
    %130 = arith.cmpi eq, %16, %129 : vector<1x128xi32>
    %131 = vector.shape_cast %120 : vector<1x1xf32> to vector<1x1xf32>
    %132 = vector.broadcast %131 : vector<1x1xf32> to vector<1x128xf32>
    %133 = arith.select %130, %132, %113 : vector<1x128xi1>, vector<1x128xf32>
    %c21_i32 = arith.constant 21 : i32
    %134 = vector.broadcast %c21_i32 : i32 to vector<1x128xi32>
    %135 = arith.cmpi eq, %16, %134 : vector<1x128xi32>
    %136 = vector.shape_cast %128 : vector<1x1xi32> to vector<1x1xi32>
    %137 = vector.broadcast %136 : vector<1x1xi32> to vector<1x128xi32>
    %138 = arith.select %135, %137, %118 : vector<1x128xi1>, vector<1x128xi32>
    %cst_32 = arith.constant dense<0xFF800000> : vector<1xf32>
    %139 = vector.multi_reduction <maximumf>, %124, %cst_32 [1] : vector<1x128xf32> to vector<1xf32>
    %140 = vector.shape_cast %139 : vector<1xf32> to vector<1x1xf32>
    %141 = vector.broadcast %140 : vector<1x1xf32> to vector<1x128xf32>
    %142 = arith.cmpf oge, %124, %141 : vector<1x128xf32>
    %cst_33 = arith.constant 0.000000e+00 : f32
    %143 = vector.broadcast %cst_33 : f32 to vector<1x128xf32>
    %144 = arith.select %142, %143, %124 : vector<1x128xi1>, vector<1x128xf32>
    %c128_i32_34 = arith.constant 128 : i32
    %145 = vector.broadcast %c128_i32_34 : i32 to vector<1x128xi32>
    %146 = arith.select %142, %16, %145 : vector<1x128xi1>, vector<1x128xi32>
    %cst_35 = arith.constant dense<2147483647> : vector<1xi32>
    %147 = vector.multi_reduction <minsi>, %146, %cst_35 [1] : vector<1x128xi32> to vector<1xi32>
    %148 = vector.shape_cast %147 : vector<1xi32> to vector<1x1xi32>
    %c14_i32 = arith.constant 14 : i32
    %149 = vector.broadcast %c14_i32 : i32 to vector<1x128xi32>
    %150 = arith.cmpi eq, %16, %149 : vector<1x128xi32>
    %151 = vector.shape_cast %140 : vector<1x1xf32> to vector<1x1xf32>
    %152 = vector.broadcast %151 : vector<1x1xf32> to vector<1x128xf32>
    %153 = arith.select %150, %152, %133 : vector<1x128xi1>, vector<1x128xf32>
    %c22_i32 = arith.constant 22 : i32
    %154 = vector.broadcast %c22_i32 : i32 to vector<1x128xi32>
    %155 = arith.cmpi eq, %16, %154 : vector<1x128xi32>
    %156 = vector.shape_cast %148 : vector<1x1xi32> to vector<1x1xi32>
    %157 = vector.broadcast %156 : vector<1x1xi32> to vector<1x128xi32>
    %158 = arith.select %155, %157, %138 : vector<1x128xi1>, vector<1x128xi32>
    %cst_36 = arith.constant dense<0xFF800000> : vector<1xf32>
    %159 = vector.multi_reduction <maximumf>, %144, %cst_36 [1] : vector<1x128xf32> to vector<1xf32>
    %160 = vector.shape_cast %159 : vector<1xf32> to vector<1x1xf32>
    %161 = vector.broadcast %160 : vector<1x1xf32> to vector<1x128xf32>
    %162 = arith.cmpf oge, %144, %161 : vector<1x128xf32>
    %cst_37 = arith.constant 0.000000e+00 : f32
    %163 = vector.broadcast %cst_37 : f32 to vector<1x128xf32>
    %164 = arith.select %162, %163, %144 : vector<1x128xi1>, vector<1x128xf32>
    %c128_i32_38 = arith.constant 128 : i32
    %165 = vector.broadcast %c128_i32_38 : i32 to vector<1x128xi32>
    %166 = arith.select %162, %16, %165 : vector<1x128xi1>, vector<1x128xi32>
    %cst_39 = arith.constant dense<2147483647> : vector<1xi32>
    %167 = vector.multi_reduction <minsi>, %166, %cst_39 [1] : vector<1x128xi32> to vector<1xi32>
    %168 = vector.shape_cast %167 : vector<1xi32> to vector<1x1xi32>
    %c15_i32 = arith.constant 15 : i32
    %169 = vector.broadcast %c15_i32 : i32 to vector<1x128xi32>
    %170 = arith.cmpi eq, %16, %169 : vector<1x128xi32>
    %171 = vector.shape_cast %160 : vector<1x1xf32> to vector<1x1xf32>
    %172 = vector.broadcast %171 : vector<1x1xf32> to vector<1x128xf32>
    %173 = arith.select %170, %172, %153 : vector<1x128xi1>, vector<1x128xf32>
    %c23_i32 = arith.constant 23 : i32
    %174 = vector.broadcast %c23_i32 : i32 to vector<1x128xi32>
    %175 = arith.cmpi eq, %16, %174 : vector<1x128xi32>
    %176 = vector.shape_cast %168 : vector<1x1xi32> to vector<1x1xi32>
    %177 = vector.broadcast %176 : vector<1x1xi32> to vector<1x128xi32>
    %178 = arith.select %175, %177, %158 : vector<1x128xi1>, vector<1x128xi32>
    %179 = arith.subf %10, %164 : vector<1x128xf32>
    %c16 = arith.constant 16 : index
    %c0_40 = arith.constant 0 : index
    %180 = vector.load %arg1[%c16, %c0_40] : memref<144x128xf32, #tpu.memory_space<vmem>>, vector<128x128xf32>
    %cst_41 = arith.constant dense<0.000000e+00> : vector<1x128xf32>
    %181 = tpu.matmul %179, %180, %cst_41 {dimension_numbers = #tpu.dot_dimension_numbers<[1], [0], [0], [1], [0, 0, 1, 1], [], []>} : vector<1x128xf32>, vector<128x128xf32>, vector<1x128xf32> -> vector<1x128xf32>
    %182 = arith.addf %181, %173 : vector<1x128xf32>
    %183 = vector.broadcast %15 : f32 to vector<1x128xf32>
    %184 = arith.mulf %182, %183 : vector<1x128xf32>
    %c16_i32_42 = arith.constant 16 : i32
    %185 = vector.broadcast %c16_i32_42 : i32 to vector<1x128xi32>
    %186 = arith.cmpi slt, %16, %185 : vector<1x128xi32>
    %187 = tpu.bitcast %178 : vector<1x128xi32> -> vector<1x128xf32>
    %188 = arith.select %186, %184, %187 : vector<1x128xi1>, vector<1x128xf32>
    %c0_43 = arith.constant 0 : index
    %c0_44 = arith.constant 0 : index
    %189 = vector.load %arg2[%c0_43, %c0_44] : memref<1x128xf32, #tpu.memory_space<vmem>>, vector<1x128xf32>
    tpu.vector_store %arg2[%c0_43, %c0_44], %188 {strides = array<i32>} : memref<1x128xf32, #tpu.memory_space<vmem>>, vector<1x128xf32>,
    return
  }
}

</mosaic_0001>

<bundles_post_ra>
// kernel: pruning_dnd_forward.1
= control target key start
LH: loop header
LB: loop body
LE: loop exit
PB: predicated region body
PF: predicated region fallthrough
CT: control target
= control target key end

     0   :  { %7 = vsyncpa [#allocation3], 0  ;;  %s564_s9 = smov [#allocation2]   ;;  %s787_s0 = inlined_call_operand.vmem [shape: f32[16,1], index: 0, kind: input, shape index: {}]   ;;  %s788_s1 = inlined_call_operand.hbm [shape: f32[144,128], index: 1, kind: input, shape index: {}]   ;;  %s789_s2 = inlined_call_operand.vmem [shape: f32[1,128], index: 2, kind: output, shape index: {}]  }
   0x1   :  { %s15_s10 = sshll.u32 %s564_s9, 4  ;;  %s540_s13 = scalar_lea.hbm %s788_s1, 2304  ;;  %s16_s10 = int_to_ptr.vmem [resolvable:$true] %s15_s10 }
   0x2   :  { %p541_p0 = scmp.ne.s32.totalorder %s788_s1, %s540_s13  ;;  %p544_p1 = scmp.lt.u32.totalorder %s540_s13, %s788_s1 }
   0x4   :  { %p546_p2 = pnand %p544_p1, %p541_p0 }
   0x6   :  { %549 = shalt.err (!%p546_p2)
}
   0x7   :  { %s550_s18 = scalar_lea.vmem %s16_s10, 2304  ;;  %p555_p4 = scmp.lt.s32.totalorder %s16_s10, %s16_s10 }
   0x8   :  { %p551_p3 = scmp.ne.s32.totalorder %s16_s10, %s550_s18  ;;  %p556_p5 = scmp.lt.s32.totalorder %s550_s18, %s550_s18 }
   0xa   :  { %p557_p6 = por %p556_p5, %p555_p4 }
   0xc   :  { %p558_p7 = pnand %p557_p6, %p551_p3 }
   0xe   :  { %561 = shalt.err (!%p558_p7)
}
   0xf   :  { %s565_s19 = smov 128   ;;  %s566_s20 = smov 8  }
  0x10   :  { %21 = dma.hbm_to_vmem [thread:$0]  %s788_s1, 2304, %s16_s10, [#allocation3], %s565_s19, %s565_s19, %s566_s20  }
  0x11   :  { %562 = dma.done.wait [#allocation3], 2304  }
  0x12   :  { %563 = vsyncadd [#allocation3], 4294964992  ;;  %v567_v0 = vmov 0   ;;  %v27_v1 = vld [vmem:[%s787_s0] sm:$0xff]  ;;  %v28_v2 = vld [vmem:[%s787_s0 + $0x8] sm:$0xff]  ;;  %v568_v3 = vmov 0.0|0.0   ;;  %v133_v26 = vlaneseq }
  0x13   :  { %535 = vset.pattern.permute.xlu0 %v567_v0  ;;  %496 = vmatprep.subr.bf16.mxu0 %v568_v3  ;;  %vm569_vm0 = vmmov 0   ;;  %v570_v4 = vmov 0.0   ;;  %v25_v6 = vld [vmem:[#allocation2] sm:$0xff]  ;;  %v26_v7 = vld [vmem:[#allocation2 + $0x8] sm:$0xff]  ;;  %vm43_vm1 = vcmask 130048   ;;  %v571_v14 = vmov 1.0  }
  0x14   :  { %31 = vperm.xlu0 %535, %v27_v1   ;;  %499 = vmatprep.subr.bf16.mxu1 %v568_v3  ;;  %vm119_vm2 = vcmask 1040384   ;;  %v632_v27 = vand.u32 127, %v133_v26  ;;  %v336_v48 = vld [vmem:[#allocation2 + $0x10] sm:$0xff]  ;;  %v337_v49 = vld [vmem:[#allocation2 + $0x18] sm:$0xff]  ;;  %v338_v50 = vld [vmem:[#allocation2 + $0x20] sm:$0xff] }
  0x15   :  { %458 = vmatprep.mubr.msk.f32.mxu0 %vm569_vm0, %v570_v4  ;;  %493 = vmatprep.mubr.msk.f32.mxu1 %vm569_vm0, %v570_v4  ;;  %v500_v51 = vpack.c.bf16 %v337_v49, %v336_v48  ;;  %v339_v52 = vld [vmem:[#allocation2 + $0x28] sm:$0xff]  ;;  %v340_v54 = vld [vmem:[#allocation2 + $0x30] sm:$0xff]  ;;  %v341_v55 = vld [vmem:[#allocation2 + $0x38] sm:$0xff] }
  0x16   :  { %v503_v53 = vpack.c.bf16 %v339_v52, %v338_v50  ;;  %v506_v56 = vpack.c.bf16 %v341_v55, %v340_v54  ;;  %v342_v57 = vld [vmem:[#allocation2 + $0x40] sm:$0xff]  ;;  %v343_v58 = vld [vmem:[#allocation2 + $0x48] sm:$0xff]  ;;  %v344_v60 = vld [vmem:[#allocation2 + $0x50] sm:$0xff] }
  0x17   :  { %501 = vmatpush3.bf16.msra.mxu1 %v500_v51  ;;  %v509_v59 = vpack.c.bf16 %v343_v58, %v342_v57  ;;  %v345_v61 = vld [vmem:[#allocation2 + $0x58] sm:$0xff]  ;;  %v346_v63 = vld [vmem:[#allocation2 + $0x60] sm:$0xff]  ;;  %v347_v0 = vld [vmem:[#allocation2 + $0x68] sm:$0xff] }
  0x18   :  { %36 = vperm.xlu0 %535, %v28_v2   ;;  %502 = vmatprep.subr.bf16.mxu1 %v568_v3  ;;  %v512_v62 = vpack.c.bf16 %v345_v61, %v344_v60  ;;  %v515_v1 = vpack.c.bf16 %v347_v0, %v346_v63  ;;  %v348_v2 = vld [vmem:[#allocation2 + $0x70] sm:$0xff]  ;;  %v349_v4 = vld [vmem:[#allocation2 + $0x78] sm:$0xff] }
  0x1b   :  { %504 = vmatpush3.bf16.msra.mxu1 %v503_v53 }
  0x1c   :  { %505 = vmatprep.subr.bf16.mxu1 %v568_v3 }
  0x1f   :  { %507 = vmatpush3.bf16.msra.mxu1 %v506_v56 }
  0x20   :  { %508 = vmatprep.subr.bf16.mxu1 %v568_v3 }
  0x23   :  { %510 = vmatpush3.bf16.msra.mxu1 %v509_v59 }
  0x24   :  { %511 = vmatprep.subr.bf16.mxu1 %v568_v3 }
  0x27   :  { %513 = vmatpush3.bf16.msra.mxu1 %v512_v62 }
  0x28   :  { %514 = vmatprep.subr.bf16.mxu1 %v568_v3 }
  0x2b   :  { %516 = vmatpush3.bf16.msra.mxu1 %v515_v1 }
  0x2c   :  { %517 = vmatprep.subr.bf16.mxu1 %v568_v3 }
  0x93   :  { %v32_v5 = vpop.permute.xlu0 %31 }
  0x94   :  { %v39_v8 = vsub.f32 %v25_v6, %v32_v5  ;;  %v518_v5 = vpack.c.bf16 %v349_v4, %v348_v2 }
  0x96   :  { %v41_v11 = vmul.f32 %v39_v8, %v39_v8  ;;  %519 = vmatpush3.bf16.msra.mxu1 %v518_v5 }
  0x97   :  { %v37_v9 = vpop.permute.xlu0 %36  ;;  %520 = vmatprep.subr.bf16.mxu1 %v568_v3 }
  0x98   :  { %v40_v10 = vsub.f32 %v26_v7, %v37_v9 }
  0x9a   :  { %v42_v12 = vmul.f32 %v40_v10, %v40_v10 }
  0x9c   :  { %v497_v13 = vpack.c.bf16 %v42_v12, %v41_v11 }
  0x9e   :  { %498 = vmatpush3.bf16.msra.mxu0 %v497_v13 }
  0xa1   :  { %459 = vmatmul.mubr.msk.f32.vlgmr.msra.gmra.mrb[0].mxu0 %vm43_vm1, %v571_v14 }
 0x174   :  { %v113_v15 = vpop.f32.mrb[0].mxu0 }
 0x175   :  { %v114_v16 = vadd.f32 0.001, %v113_v15  ;;  %v460_v17 = vpop.f32.mrb[1].mxu0 }
 0x177   :  { %536 = vrcp.f32 %v114_v16 }
 0x181   :  { %v607_v18 = vpop.eup %536 }
 0x182   :  { %v135_v19 = vsel %vm119_vm2, %v607_v18, -inf  ;;  %v120_v16 = vsel %vm119_vm2, %v607_v18, 0.0 }
 0x183   :  { %136 = vmax.xlane.f32.xlu1 %v135_v19 }
 0x210   :  { %v611_v20 = vpop.xlane.xlu1 %136 }
 0x211   :  { %vm138_vm3 = vcmp.ge.f32.partialorder %v607_v18, %v611_v20 }
 0x212   :  { %v619_v21 = vsel %vm138_vm3, 0.0, %v607_v18  ;;  %v140_v6 = vsel %vm138_vm3, %v632_v27, 128  ;;  %vm158_vm3 = vcmp.eq.s32.totalorder %v632_v27, 16 }
 0x213   :  { %v160_v22 = vsel %vm119_vm2, %v619_v21, -inf  ;;  %v141_v12 = vsel %vm119_vm2, %v140_v6, 2147483647 }
 0x214   :  { %161 = vmax.xlane.f32.xlu1 %v160_v22  ;;  %v143_v15 = vshra.s32 %v141_v12, 16  ;;  %v142_v51 = vand.u32 65535, %v141_v12 }
 0x216   :  { %v144_v57 = vcvt.s32.f32 %v142_v51 }
 0x2a1   :  { %v623_v23 = vpop.xlane.xlu1 %161 }
 0x2a2   :  { %vm163_vm4 = vcmp.ge.f32.partialorder %v619_v21, %v623_v23 }
 0x2a3   :  { %v164_v24 = vsel %vm163_vm4, 0.0, %v619_v21  ;;  %v165_v3 = vsel %vm163_vm4, %v632_v27, 128  ;;  %v145_v21 = vcvt.s32.f32 %v143_v15  ;;  %vm183_vm4 = vcmp.eq.s32.totalorder %v632_v27, 17 }
 0x2a4   :  { %v185_v25 = vsel %vm119_vm2, %v164_v24, -inf  ;;  %v166_v17 = vsel %vm119_vm2, %v165_v3, 2147483647 }
 0x2a5   :  { %186 = vmax.xlane.f32.xlu0 %v185_v25  ;;  %v168_v22 = vshra.s32 %v166_v17, 16  ;;  %v167_v59 = vand.u32 65535, %v166_v17 }
 0x2a7   :  { %v170_v26 = vcvt.s32.f32 %v168_v22  ;;  %v169_v1 = vcvt.s32.f32 %v167_v59 }
 0x332   :  { %v634_v28 = vpop.xlane.xlu0 %186 }
 0x333   :  { %vm188_vm5 = vcmp.ge.f32.partialorder %v164_v24, %v634_v28 }
 0x334   :  { %v190_v29 = vsel %vm188_vm5, %v632_v27, 128  ;;  %v638_v30 = vsel %vm188_vm5, 0.0, %v164_v24  ;;  %vm208_vm5 = vcmp.eq.s32.totalorder %v632_v27, 18 }
 0x335   :  { %v210_v31 = vsel %vm119_vm2, %v638_v30, -inf  ;;  %v643_v32 = vsel %vm119_vm2, %v190_v29, 2147483647 }
 0x336   :  { %211 = vmax.xlane.f32.xlu1 %v210_v31  ;;  %v193_v33 = vshra.s32 %v643_v32, 16  ;;  %v192_v58 = vand.u32 65535, %v643_v32 }
 0x338   :  { %v646_v34 = vcvt.s32.f32 %v193_v33  ;;  %v351_v33 = vld [vmem:[#allocation2 + $0x88] sm:$0xff]  ;;  %v194_v0 = vcvt.s32.f32 %v192_v58 }
 0x33a   :  { %196 = vmin.xlane.f32.xlu0 %v646_v34 }
 0x3c3   :  { %v649_v35 = vpop.xlane.xlu1 %211 }
 0x3c4   :  { %vm213_vm6 = vcmp.ge.f32.partialorder %v638_v30, %v649_v35 }
 0x3c5   :  { %v214_v36 = vsel %vm213_vm6, 0.0, %v638_v30  ;;  %v215_v19 = vsel %vm213_vm6, %v632_v27, 128  ;;  %v350_v30 = vld [vmem:[#allocation2 + $0x80] sm:$0xff]  ;;  %vm233_vm6 = vcmp.eq.s32.totalorder %v632_v27, 19 }
 0x3c6   :  { %v235_v37 = vsel %vm119_vm2, %v214_v36, -inf  ;;  %v216_v24 = vsel %vm119_vm2, %v215_v19, 2147483647 }
 0x3c7   :  { %236 = vmax.xlane.f32.xlu1 %v235_v37  ;;  %v218_v29 = vshra.s32 %v216_v24, 16  ;;  %v732_v55 = vpop.xlane.xlu0 %196  ;;  %v217_v4 = vand.u32 65535, %v216_v24 }
 0x3c8   :  { %vm198_vm12 = vcmp.eq.f32.partialorder %v646_v34, %v732_v55 }
 0x3c9   :  { %v220_v37 = vcvt.s32.f32 %v218_v29  ;;  %v199_v32 = vsel %vm198_vm12, %v194_v0, inf  ;;  %v219_v12 = vcvt.s32.f32 %v217_v4  ;;  %vm281_vm12 = vcmp.eq.s32.totalorder %v632_v27, 13 }
 0x454   :  { %v658_v38 = vpop.xlane.xlu1 %236 }
 0x455   :  { %vm238_vm7 = vcmp.ge.f32.partialorder %v214_v36, %v658_v38 }
 0x456   :  { %v240_v39 = vsel %vm238_vm7, %v632_v27, 128  ;;  %v662_v40 = vsel %vm238_vm7, 0.0, %v214_v36  ;;  %v521_v36 = vpack.c.bf16 %v351_v33, %v350_v30  ;;  %vm156_vm7 = vcmp.eq.s32.totalorder %v632_v27, 8 }
 0x457   :  { %v260_v41 = vsel %vm119_vm2, %v662_v40, -inf  ;;  %v667_v42 = vsel %vm119_vm2, %v240_v39, 2147483647 }
 0x458   :  { %261 = vmax.xlane.f32.xlu1 %v260_v41  ;;  %v243_v43 = vshra.s32 %v667_v42, 16  ;;  %522 = vmatpush3.bf16.msra.mxu1 %v521_v36  ;;  %v242_v2 = vand.u32 65535, %v667_v42  ;;  %v203_v36 = vcvt.f32.s32 %v732_v55 }
 0x45a   :  { %v670_v44 = vcvt.s32.f32 %v243_v43 }
 0x45c   :  { %246 = vmin.xlane.f32.xlu0 %v670_v44 }
 0x4e5   :  { %v673_v45 = vpop.xlane.xlu1 %261 }
 0x4e6   :  { %vm263_vm8 = vcmp.ge.f32.partialorder %v662_v40, %v673_v45 }
 0x4e7   :  { %v264_v46 = vsel %vm263_vm8, 0.0, %v662_v40  ;;  %v265_v25 = vsel %vm263_vm8, %v632_v27, 128  ;;  %vm181_vm8 = vcmp.eq.s32.totalorder %v632_v27, 9 }
 0x4e8   :  { %v285_v47 = vsel %vm119_vm2, %v264_v46, -inf  ;;  %v723_v31 = vsel %vm119_vm2, %v265_v25, 2147483647 }
 0x4e9   :  { %286 = vmax.xlane.f32.xlu1 %v285_v47  ;;  %v268_v39 = vshra.s32 %v723_v31, 16  ;;  %v737_v62 = vpop.xlane.xlu0 %246  ;;  %v267_v42 = vand.u32 65535, %v723_v31 }
 0x4ea   :  { %vm248_vm14 = vcmp.eq.f32.partialorder %v670_v44, %v737_v62 }
 0x4eb   :  { %v270_v41 = vcvt.s32.f32 %v268_v39  ;;  %v269_v17 = vcvt.s32.f32 %v267_v42 }
 0x576   :  { %v693_v7 = vpop.xlane.xlu1 %286 }
 0x577   :  { %vm288_vm9 = vcmp.ge.f32.partialorder %v264_v46, %v693_v7 }
 0x578   :  { %v290_v8 = vsel %vm288_vm9, %v632_v27, 128  ;;  %v289_v9 = vsel %vm288_vm9, 0.0, %v264_v46  ;;  %vm206_vm9 = vcmp.eq.s32.totalorder %v632_v27, 10 }
 0x579   :  { %v310_v10 = vsel %vm119_vm2, %v289_v9, -inf  ;;  %v699_v11 = vsel %vm119_vm2, %v290_v8, 2147483647 }
 0x57a   :  { %311 = vmax.xlane.f32.xlu1 %v310_v10  ;;  %v293_v13 = vshra.s32 %v699_v11, 16  ;;  %v244_v10 = vcvt.s32.f32 %v242_v2  ;;  %v292_v3 = vand.u32 65535, %v699_v11 }
 0x57c   :  { %v707_v14 = vcvt.s32.f32 %v293_v13  ;;  %v249_v13 = vsel %vm248_vm14, %v244_v10, inf  ;;  %v294_v44 = vcvt.s32.f32 %v292_v3  ;;  %vm331_vm14 = vcmp.eq.s32.totalorder %v632_v27, 15 }
 0x57e   :  { %296 = vmin.xlane.f32.xlu0 %v707_v14  ;;  %121 = vadd.xlane.f32.xlu1 %v120_v16 }
 0x582   :  { %146 = vmin.xlane.f32.xlu1 %v145_v21 }
 0x586   :  { %171 = vmin.xlane.f32.xlu1 %v170_v26 }
 0x58a   :  { %221 = vmin.xlane.f32.xlu1 %v220_v37 }
 0x58e   :  { %271 = vmin.xlane.f32.xlu1 %v270_v41 }
 0x607   :  { %v726_v43 = vpop.xlane.xlu1 %311 }
 0x608   :  { %vm313_vm10 = vcmp.ge.f32.partialorder %v289_v9, %v726_v43 }
 0x609   :  { %v314_v40 = vsel %vm313_vm10, 0.0, %v289_v9  ;;  %v315_v46 = vsel %vm313_vm10, %v632_v27, 128  ;;  %vm231_vm10 = vcmp.eq.s32.totalorder %v632_v27, 11 }
 0x60a   :  { %v335_v47 = vsub.f32 %v607_v18, %v314_v40  ;;  %v316_v48 = vsel %vm119_vm2, %v315_v46, 2147483647 }
 0x60b   :  { %v122_v49 = vpop.xlane.xlu1 %121  ;;  %v318_v50 = vshra.s32 %v316_v48, 16  ;;  %v742_v34 = vpop.xlane.xlu0 %296  ;;  %v317_v24 = vand.u32 65535, %v316_v48 }
 0x60c   :  { %v123_v52 = vrot.slane %v122_v49, 4  ;;  %494 = vmatmul.mubr.f32.vlgmr.msra.gmra.mrb[0].mxu1 %v335_v47  ;;  %vm298_vm0 = vcmp.eq.f32.partialorder %v707_v14, %v742_v34  ;;  %v303_v3 = vcvt.f32.s32 %v742_v34 }
 0x60d   :  { %v320_v53 = vcvt.s32.f32 %v318_v50  ;;  %v299_v19 = vsel %vm298_vm0, %v294_v44, inf  ;;  %v204_v50 = vshll.u32 %v203_v36, 16  ;;  %vm283_vm0 = vcmp.eq.s32.totalorder %v632_v27, 21 }
 0x60e   :  { %v124_v54 = vadd.f32 %v123_v52, %v122_v49 }
 0x60f   :  { %321 = vmin.xlane.f32.xlu1 %v320_v53  ;;  %v147_v56 = vpop.xlane.xlu1 %146 }
 0x610   :  { %v125_v60 = vrot.slane %v124_v54, 2  ;;  %vm148_vm11 = vcmp.eq.f32.partialorder %v145_v21, %v147_v56  ;;  %v153_v14 = vcvt.f32.s32 %v147_v56 }
 0x611   :  { %v149_v18 = vsel %vm148_vm11, %v144_v57, inf  ;;  %vm256_vm11 = vcmp.eq.s32.totalorder %v632_v27, 12 }
 0x612   :  { %150 = vmin.xlane.f32.xlu0 %v149_v18  ;;  %v126_v61 = vadd.f32 %v125_v60, %v124_v54  ;;  %v157_v18 = vsel %vm156_vm7, %v611_v20, 0.0 }
 0x613   :  { %v172_v63 = vpop.xlane.xlu1 %171 }
 0x614   :  { %vm173_vm13 = vcmp.eq.f32.partialorder %v170_v26, %v172_v63  ;;  %v127_v5 = vrot.slane %v126_v61, 1  ;;  %v319_v26 = vcvt.s32.f32 %v317_v24  ;;  %v178_v31 = vcvt.f32.s32 %v172_v63 }
 0x615   :  { %v174_v6 = vsel %vm173_vm13, %v169_v1, inf  ;;  %vm306_vm13 = vcmp.eq.s32.totalorder %v632_v27, 14 }
 0x616   :  { %200 = vmin.xlane.f32.xlu0 %v199_v32  ;;  %175 = vmin.xlane.f32.xlu1 %v174_v6  ;;  %v128_v8 = vadd.f32 %v127_v5, %v126_v61  ;;  %v179_v39 = vshll.u32 %v178_v31, 16  ;;  %v182_v61 = vsel %vm181_vm8, %v623_v23, %v157_v18  ;;  %v253_v6 = vcvt.f32.s32 %v737_v62 }
 0x617   :  { %v222_v9 = vpop.xlane.xlu1 %221  ;;  %v207_v63 = vsel %vm206_vm9, %v634_v28, %v182_v61 }
 0x618   :  { %523 = vpush %v128_v8  ;;  %vm223_vm15 = vcmp.eq.f32.partialorder %v220_v37, %v222_v9  ;;  %v154_v37 = vshll.u32 %v153_v14, 16  ;;  %v228_v47 = vcvt.f32.s32 %v222_v9  ;;  %v232_v0 = vsel %vm231_vm10, %v649_v35, %v207_v63 }
 0x619   :  { %v224_v15 = vsel %vm223_vm15, %v219_v12, inf  ;;  %v257_v1 = vsel %vm256_vm11, %v658_v38, %v232_v0  ;;  %v254_v12 = vshll.u32 %v253_v6, 16  ;;  %vm258_vm15 = vcmp.eq.s32.totalorder %v632_v27, 20 }
 0x61a   :  { %250 = vmin.xlane.f32.xlu0 %v249_v13  ;;  %225 = vmin.xlane.f32.xlu1 %v224_v15  ;;  %v229_v56 = vshll.u32 %v228_v47, 16  ;;  %v282_v20 = vsel %vm281_vm12, %v673_v45, %v257_v1  ;;  %v304_v15 = vshll.u32 %v303_v3, 16 }
 0x61b   :  { %v748_v16 = vpop.xlane.xlu1 %271  ;;  %v307_v2 = vsel %vm306_vm13, %v693_v7, %v282_v20 }
 0x61c   :  { %vm273_vm1 = vcmp.eq.f32.partialorder %v270_v41, %v748_v16  ;;  %v332_v23 = vsel %vm331_vm14, %v726_v43, %v307_v2  ;;  %v278_v35 = vcvt.f32.s32 %v748_v16 }
 0x61d   :  { %v274_v21 = vsel %vm273_vm1, %v269_v17, inf  ;;  %vm308_vm1 = vcmp.eq.s32.totalorder %v632_v27, 22 }
 0x61e   :  { %300 = vmin.xlane.f32.xlu0 %v299_v19  ;;  %275 = vmin.xlane.f32.xlu1 %v274_v21  ;;  %v279_v45 = vshll.u32 %v278_v35, 16 }
 0x649   :  { %s524_s0 = spop %523 }
 0x64a   :  { %v130_v11 = vstv %s524_s0 }
 0x64b   :  { %538 = vrcp.f32 %v130_v11 }
 0x655   :  { %v539_v22 = vpop.eup %538 }
 0x656   :  { %525 = vpush %v539_v22 }
 0x687   :  { %s526_s1 = spop %525 }
 0x688   :  { %v422_v21 = vstv %s526_s1 }
 0x69c   :  { %v751_v25 = vpop.xlane.xlu1 %321 }
 0x69d   :  { %vm323_vm2 = vcmp.eq.f32.partialorder %v320_v53, %v751_v25  ;;  %v328_v43 = vcvt.f32.s32 %v751_v25 }
 0x69e   :  { %v324_v29 = vsel %vm323_vm2, %v319_v26, inf  ;;  %vm333_vm2 = vcmp.eq.s32.totalorder %v632_v27, 23 }
 0x69f   :  { %v151_v30 = vpop.xlane.xlu0 %150  ;;  %325 = vmin.xlane.f32.xlu1 %v324_v29  ;;  %v329_v17 = vshll.u32 %v328_v43, 16 }
 0x6a0   :  { %v152_v33 = vcvt.f32.s32 %v151_v30 }
 0x6a2   :  { %v155_v41 = vadd.s32 %v154_v37, %v152_v33 }
 0x6a3   :  { %v201_v40 = vpop.xlane.xlu0 %200  ;;  %v176_v46 = vpop.xlane.xlu1 %175 }
 0x6a4   :  { %v202_v48 = vcvt.f32.s32 %v201_v40  ;;  %v177_v49 = vcvt.f32.s32 %v176_v46  ;;  %v159_v52 = vsel %vm158_vm3, %v155_v41, 0  ;;  %vm424_vm3 = vcmp.lt.s32.totalorder %v632_v27, 16 }
 0x6a6   :  { %v180_v51 = vadd.s32 %v179_v39, %v177_v49  ;;  %v205_v53 = vadd.s32 %v204_v50, %v202_v48 }
 0x6a7   :  { %v226_v54 = vpop.xlane.xlu1 %225  ;;  %v251_v28 = vpop.xlane.xlu0 %250 }
 0x6a8   :  { %v184_v57 = vsel %vm183_vm4, %v180_v51, %v159_v52  ;;  %v227_v55 = vcvt.f32.s32 %v226_v54  ;;  %v252_v9 = vcvt.f32.s32 %v251_v28 }
 0x6a9   :  { %v209_v59 = vsel %vm208_vm5, %v205_v53, %v184_v57 }
 0x6aa   :  { %v230_v58 = vadd.s32 %v229_v56, %v227_v55  ;;  %v255_v42 = vadd.s32 %v254_v12, %v252_v9 }
 0x6ab   :  { %v276_v8 = vpop.xlane.xlu1 %275  ;;  %v301_v10 = vpop.xlane.xlu0 %300 }
 0x6ac   :  { %v234_v60 = vsel %vm233_vm6, %v230_v58, %v209_v59  ;;  %v277_v38 = vcvt.f32.s32 %v276_v8  ;;  %v302_v7 = vcvt.f32.s32 %v301_v10 }
 0x6ad   :  { %v259_v16 = vsel %vm258_vm15, %v255_v42, %v234_v60 }
 0x6ae   :  { %v280_v13 = vadd.s32 %v279_v45, %v277_v38  ;;  %v305_v62 = vadd.s32 %v304_v15, %v302_v7 }
 0x6b0   :  { %v284_v19 = vsel %vm283_vm0, %v280_v13, %v259_v16 }
 0x6b1   :  { %v309_v24 = vsel %vm308_vm1, %v305_v62, %v284_v19 }
 0x6df   :  { %v418_v4 = vpop.f32.mrb[0].mxu1 }
 0x6e0   :  { %v419_v5 = vadd.f32 %v418_v4, %v332_v23  ;;  %v495_v32 = vpop.f32.mrb[1].mxu1 }
 0x6e2   :  { %v423_v22 = vmul.f32 %v422_v21, %v419_v5 }
 0x72c   :  { %v326_v44 = vpop.xlane.xlu1 %325 }
 0x72d   :  { %v327_v34 = vcvt.f32.s32 %v326_v44 }
 0x72f   :  { %v330_v11 = vadd.s32 %v329_v17, %v327_v34 }
 0x731   :  { %v334_v25 = vsel %vm333_vm2, %v330_v11, %v309_v24 }
 0x732   :  { %v426_v26 = vsel %vm424_vm3, %v423_v22, %v334_v25 }
 0x733   :  { %427 = vst [vmem:[%s789_s2] sm:$0x1] %v426_v26 }
 0x734   :  { %432 = vsyncpa [#allocation3], 1 }

</bundles_post_ra>
